<compile_context>
chip_gen: v5e
topology: v5e:2x2
jax: 0.10.0
libtpu: 0.0.40
codegen_flags: <defaults>
</compile_context>

<pallas_src>
import jax
import jax.numpy as jnp
from jax.experimental import pallas as pl
from jax.experimental.pallas import tpu as pltpu


def _make_conv_relu_kernel(H: int, W: int, activate: bool):
    L = H * W

    def kernel(x_ref, w_ref, b_ref, o_ref):
        # x_ref: (NB, Cin, H*W)   flattened-spatial images (lane axis = H*W)
        # w_ref: (Cout, 9*Cin)    weights, K index = (kh*3 + kw)*Cin + ci
        # b_ref: (Cout, 1)        bias
        # o_ref: (NB, Cout, H*W)  output (lane-dense stores)
        nb, cin, _ = x_ref.shape
        dtype = x_ref.dtype

        # Column index of every flattened-spatial lane.  Shifting the
        # flattened image by dw = +/-1 would wrap between rows; zeroing the
        # source column that would wrap restores exact zero-padding
        # semantics.  Hoisted: shared by all images and all taps.
        col = jax.lax.broadcasted_iota(jnp.int32, (cin, L), 1) % W
        keep_for_dw_m1 = col != (W - 1)   # reading column w-1: col W-1 never valid
        keep_for_dw_p1 = col != 0         # reading column w+1: col 0  never valid

        w_mat = w_ref[...]                # (Cout, 9*Cin)
        bias = b_ref[...]                 # (Cout, 1) -> broadcasts over lanes

        for b in range(nb):               # NB is small & static -> unrolled
            x2d = x_ref[b]                # (Cin, L)
            src_by_dw = {
                -1: jnp.where(keep_for_dw_m1, x2d, 0.0),
                0: x2d,
                1: jnp.where(keep_for_dw_p1, x2d, 0.0),
            }

            # Build the (9*Cin, L) patch: one zero-filled lane shift per tap.
            # Out-of-range rows (dh) fall off the end of the flattened axis
            # and are zero-filled by construction; column wrap-around (dw)
            # is killed by the masks above.
            pieces = []
            for kh in range(3):
                dh = kh - 1
                for kw in range(3):
                    dw = kw - 1
                    s = dh * W + dw       # shifted[:, p] = x[:, p + s] (0 outside)
                    src = src_by_dw[dw]
                    if s == 0:
                        shifted = src
                    elif s > 0:
                        pad = jnp.zeros((cin, s), dtype)
                        shifted = jnp.concatenate([src[:, s:], pad], axis=1)
                    else:
                        pad = jnp.zeros((cin, -s), dtype)
                        shifted = jnp.concatenate([pad, src[:, : L + s]], axis=1)
                    pieces.append(shifted)
            patch = jnp.concatenate(pieces, axis=0)          # (9*Cin, L)

            # Whole conv for this image = ONE MXU matmul, K = 9*Cin.
            acc = jnp.dot(w_mat, patch, preferred_element_type=jnp.float32)
            acc = acc + bias
            if activate:
                acc = jnp.maximum(acc, 0.0)
            o_ref[b] = acc.astype(o_ref.dtype)               # dense (Cout, L) store

    return kernel


def conv_relu(x_nchw, weight, bias, *, activate: bool = True, images_per_block=None):
    """3x3 conv (stride 1, padding 1) + optional ReLU.  NCHW in / NCHW out.

    x_nchw : (N, Cin, H, W)      -- PyTorch layout
    weight : (Cout, Cin, 3, 3)   -- PyTorch Conv2d weight layout
    bias   : (Cout,)
    """
    N, Cin, H, W = x_nchw.shape
    Cout = weight.shape[0]
    assert weight.shape == (Cout, Cin, 3, 3)
    L = H * W
    # TODO(synk): for very large H*W an extra H-tile grid axis with a 2-row
    # halo (Element-indexed or manual DMA) would be needed; not required for
    # the shapes this module is used with.

    # Free, metadata-only reshapes: no transpose / pad HBM passes.
    x_flat = x_nchw.reshape(N, Cin, L)
    # (Cout, Cin, 3, 3) -> (Cout, 3, 3, Cin) -> (Cout, 9*Cin); matches the
    # patch row order (kh*3 + kw)*Cin + ci built in the kernel.  Tiny one-off.
    w_mat = jnp.transpose(weight, (0, 2, 3, 1)).reshape(Cout, 9 * Cin)
    b_mat = bias.reshape(Cout, 1)
    # NOTE: on v6e/v7x, casting x_flat / w_mat to bfloat16 here (keeping the
    # in-kernel f32 accumulation) would halve HBM traffic; kept f32 for exactness.

    # ---- images per grid step -------------------------------------------
    if images_per_block is None:
        per_image_bytes = (Cin + Cout) * L * x_nchw.dtype.itemsize
        nb = max(1, min(N, (512 * 1024) // max(per_image_bytes, 1)))
        if N >= 2:                       # keep >= 2 parallel steps (v7x: 2 TCs)
            nb = min(nb, max(1, N // 2))
    else:
        nb = max(1, min(N, int(images_per_block)))
    while N % nb:                        # keep the grid evenly divided
        nb -= 1
    grid = (N // nb,)

    # ---- conservative VMEM budget (double-buffered blocks + temporaries) --
    def _rup(v, m):
        return -(-v // m) * m
    lane_bytes = _rup(L, 128) * 4
    blocks = 2 * nb * (_rup(Cin, 8) + _rup(Cout, 8)) * lane_bytes       # x + out, 2 bufs
    weights = 2 * _rup(Cout, 8) * (_rup(9 * Cin, 128) + 128) * 4        # w + bias, 2 bufs
    temps = (_rup(9 * Cin, 8) + 12 * _rup(Cin, 8)) * lane_bytes         # patch + pieces
    vmem_limit = int(min(max(blocks + weights + temps + (8 << 20), 24 << 20), 48 << 20))

    kernel = _make_conv_relu_kernel(H, W, activate)
    out_flat = pl.pallas_call(
        kernel,
        out_shape=jax.ShapeDtypeStruct((N, Cout, L), x_nchw.dtype),
        grid_spec=pltpu.PrefetchScalarGridSpec(
            num_scalar_prefetch=0,
            grid=grid,
            in_specs=[
                pl.BlockSpec((nb, Cin, L), lambda i: (i, 0, 0)),
                pl.BlockSpec((Cout, 9 * Cin), lambda i: (0, 0)),
                pl.BlockSpec((Cout, 1), lambda i: (0, 0)),
            ],
            out_specs=pl.BlockSpec((nb, Cout, L), lambda i: (i, 0, 0)),
        ),
        compiler_params=pltpu.CompilerParams(
            dimension_semantics=("parallel",),
            vmem_limit_bytes=vmem_limit,
        ),
    )(x_flat, w_mat, b_mat)

    return out_flat.reshape(N, Cout, H, W)


def _reference(x_nchw, weight, bias, activate=True):
    y = jax.lax.conv_general_dilated(
        x_nchw, weight, window_strides=(1, 1), padding="SAME",
        dimension_numbers=("NCHW", "OIHW", "NCHW"))
    y = y + bias[None, :, None, None]
    if activate:
        y = jnp.maximum(y, 0.0)
    return y


if __name__ == "__main__":
    key = jax.random.PRNGKey(0)
    k_x, k_w, k_b = jax.random.split(key, 3)

    N, Cin, Cout, H, W = 2, 4, 8, 16, 16

    x = jax.random.normal(k_x, (N, Cin, H, W), dtype=jnp.float32)
    # Deterministic "Conv2d(in_=4, out=8, kernel=3)" parameter init.
    fan_in = Cin * 3 * 3
    bound = 1.0 / (fan_in ** 0.5)
    weight = jax.random.uniform(k_w, (Cout, Cin, 3, 3), jnp.float32,
                                minval=-bound, maxval=bound)
    bias = jax.random.uniform(k_b, (Cout,), jnp.float32,
                              minval=-bound, maxval=bound)

    out = jax.block_until_ready(conv_relu(x, weight, bias, activate=True))
    ref = _reference(x, weight, bias, activate=True)
    assert out.shape == (N, Cout, H, W)
    assert jnp.allclose(out, ref, atol=2e-3, rtol=2e-3), "mismatch (activate=True)"

    out_na = jax.block_until_ready(conv_relu(x, weight, bias, activate=False))
    ref_na = _reference(x, weight, bias, activate=False)
    assert jnp.allclose(out_na, ref_na, atol=2e-3, rtol=2e-3), "mismatch (activate=False)"

    print("KERNEL_OK")
</pallas_src>

<mosaic_0001>
module attributes {stable_mosaic.version = 11 : i64} {
  func.func @kernel(%arg0: i32, %arg1: memref<1x4x256xf32, #tpu.memory_space<vmem>>, %arg2: memref<8x36xf32, #tpu.memory_space<vmem>>, %arg3: memref<8x1xf32, #tpu.memory_space<vmem>>, %arg4: memref<1x8x256xf32, #tpu.memory_space<vmem>>) attributes {dimension_semantics = [#tpu.dimension_semantics<parallel>], iteration_bounds = array<i64: 2>, scalar_prefetch = 0 : i64, scratch_operands = 0 : i64, tpu.core_type = #tpu.core_type<tc>, window_params = [{transform_indices = @transform_0, window_bounds = array<i64: 1, 4, 256>}, {pipeline_mode = #tpu.pipeline_mode<synchronous>, transform_indices = @transform_1, window_bounds = array<i64: 8, 36>}, {pipeline_mode = #tpu.pipeline_mode<synchronous>, transform_indices = @transform_2, window_bounds = array<i64: 8, 1>}, {transform_indices = @transform_3, window_bounds = array<i64: 1, 8, 256>}]} {
    %0 = tpu.iota {dimensions = array<i32: 1>} : vector<4x256xi32>
    %c16_i32 = arith.constant 16 : i32
    %c0_i32 = arith.constant 0 : i32
    %1 = arith.cmpi eq, %c16_i32, %c0_i32 : i32
    %c1_i32 = arith.constant 1 : i32
    %2 = arith.select %1, %c1_i32, %c16_i32 : i32
    %3 = vector.broadcast %2 : i32 to vector<4x256xi32>
    %4 = arith.remsi %0, %3 : vector<4x256xi32>
    %c0_i32_0 = arith.constant 0 : i32
    %5 = vector.broadcast %c0_i32_0 : i32 to vector<4x256xi32>
    %6 = arith.cmpi ne, %4, %5 : vector<4x256xi32>
    %c0_i32_1 = arith.constant 0 : i32
    %7 = vector.broadcast %c0_i32_1 : i32 to vector<4x256xi32>
    %8 = arith.cmpi slt, %4, %7 : vector<4x256xi32>
    %c0_i32_2 = arith.constant 0 : i32
    %9 = arith.cmpi slt, %2, %c0_i32_2 : i32
    %10 = vector.broadcast %9 : i1 to vector<4x256xi1>
    %11 = vector.broadcast %10 : vector<4x256xi1> to vector<4x256xi1>
    %12 = arith.xori %8, %11 : vector<4x256xi1>
    %13 = arith.andi %12, %6 : vector<4x256xi1>
    %14 = vector.broadcast %2 : i32 to vector<4x256xi32>
    %15 = arith.addi %4, %14 : vector<4x256xi32>
    %16 = arith.select %13, %15, %4 : vector<4x256xi1>, vector<4x256xi32>
    %c15_i32 = arith.constant 15 : i32
    %17 = vector.broadcast %c15_i32 : i32 to vector<4x256xi32>
    %18 = arith.cmpi ne, %16, %17 : vector<4x256xi32>
    %c0_i32_3 = arith.constant 0 : i32
    %19 = vector.broadcast %c0_i32_3 : i32 to vector<4x256xi32>
    %20 = arith.cmpi ne, %16, %19 : vector<4x256xi32>
    %c0 = arith.constant 0 : index
    %c0_4 = arith.constant 0 : index
    %21 = vector.load %arg2[%c0, %c0_4] : memref<8x36xf32, #tpu.memory_space<vmem>>, vector<8x36xf32>
    %c0_5 = arith.constant 0 : index
    %c0_6 = arith.constant 0 : index
    %22 = vector.load %arg3[%c0_5, %c0_6] : memref<8x1xf32, #tpu.memory_space<vmem>>, vector<8x1xf32>
    %c0_7 = arith.constant 0 : index
    %c0_8 = arith.constant 0 : index
    %c0_9 = arith.constant 0 : index
    %23 = vector.load %arg1[%c0_7, %c0_8, %c0_9] : memref<1x4x256xf32, #tpu.memory_space<vmem>>, vector<1x4x256xf32>
    %24 = vector.shape_cast %23 : vector<1x4x256xf32> to vector<4x256xf32>
    %cst = arith.constant 0.000000e+00 : f32
    %25 = vector.broadcast %cst : f32 to vector<4x256xf32>
    %26 = arith.select %18, %24, %25 : vector<4x256xi1>, vector<4x256xf32>
    %cst_10 = arith.constant 0.000000e+00 : f32
    %27 = vector.broadcast %cst_10 : f32 to vector<4x256xf32>
    %28 = arith.select %20, %24, %27 : vector<4x256xi1>, vector<4x256xf32>
    %cst_11 = arith.constant 0.000000e+00 : f32
    %29 = vector.broadcast %cst_11 : f32 to vector<4x17xf32>
    %30 = vector.extract_strided_slice %26 {offsets = [0, 0], sizes = [4, 239], strides = [1, 1]} : vector<4x256xf32> to vector<4x239xf32>
    %31 = tpu.concatenate %29, %30 in 1 : vector<4x17xf32>, vector<4x239xf32> -> vector<4x256xf32>
    %cst_12 = arith.constant 0.000000e+00 : f32
    %32 = vector.broadcast %cst_12 : f32 to vector<4x16xf32>
    %33 = vector.extract_strided_slice %24 {offsets = [0, 0], sizes = [4, 240], strides = [1, 1]} : vector<4x256xf32> to vector<4x240xf32>
    %34 = tpu.concatenate %32, %33 in 1 : vector<4x16xf32>, vector<4x240xf32> -> vector<4x256xf32>
    %cst_13 = arith.constant 0.000000e+00 : f32
    %35 = vector.broadcast %cst_13 : f32 to vector<4x15xf32>
    %36 = vector.extract_strided_slice %28 {offsets = [0, 0], sizes = [4, 241], strides = [1, 1]} : vector<4x256xf32> to vector<4x241xf32>
    %37 = tpu.concatenate %35, %36 in 1 : vector<4x15xf32>, vector<4x241xf32> -> vector<4x256xf32>
    %cst_14 = arith.constant 0.000000e+00 : f32
    %38 = vector.broadcast %cst_14 : f32 to vector<4x1xf32>
    %39 = vector.extract_strided_slice %26 {offsets = [0, 0], sizes = [4, 255], strides = [1, 1]} : vector<4x256xf32> to vector<4x255xf32>
    %40 = tpu.concatenate %38, %39 in 1 : vector<4x1xf32>, vector<4x255xf32> -> vector<4x256xf32>
    %cst_15 = arith.constant 0.000000e+00 : f32
    %41 = vector.broadcast %cst_15 : f32 to vector<4x1xf32>
    %42 = vector.extract_strided_slice %28 {offsets = [0, 1], sizes = [4, 255], strides = [1, 1]} : vector<4x256xf32> to vector<4x255xf32>
    %43 = tpu.concatenate %42, %41 in 1 : vector<4x255xf32>, vector<4x1xf32> -> vector<4x256xf32>
    %cst_16 = arith.constant 0.000000e+00 : f32
    %44 = vector.broadcast %cst_16 : f32 to vector<4x15xf32>
    %45 = vector.extract_strided_slice %26 {offsets = [0, 15], sizes = [4, 241], strides = [1, 1]} : vector<4x256xf32> to vector<4x241xf32>
    %46 = tpu.concatenate %45, %44 in 1 : vector<4x241xf32>, vector<4x15xf32> -> vector<4x256xf32>
    %cst_17 = arith.constant 0.000000e+00 : f32
    %47 = vector.broadcast %cst_17 : f32 to vector<4x16xf32>
    %48 = vector.extract_strided_slice %24 {offsets = [0, 16], sizes = [4, 240], strides = [1, 1]} : vector<4x256xf32> to vector<4x240xf32>
    %49 = tpu.concatenate %48, %47 in 1 : vector<4x240xf32>, vector<4x16xf32> -> vector<4x256xf32>
    %cst_18 = arith.constant 0.000000e+00 : f32
    %50 = vector.broadcast %cst_18 : f32 to vector<4x17xf32>
    %51 = vector.extract_strided_slice %28 {offsets = [0, 17], sizes = [4, 239], strides = [1, 1]} : vector<4x256xf32> to vector<4x239xf32>
    %52 = tpu.concatenate %51, %50 in 1 : vector<4x239xf32>, vector<4x17xf32> -> vector<4x256xf32>
    %53 = tpu.concatenate %31, %34, %37, %40, %24, %43, %46, %49, %52 in 0 : vector<4x256xf32>, vector<4x256xf32>, vector<4x256xf32>, vector<4x256xf32>, vector<4x256xf32>, vector<4x256xf32>, vector<4x256xf32>, vector<4x256xf32>, vector<4x256xf32> -> vector<36x256xf32>
    %cst_19 = arith.constant dense<0.000000e+00> : vector<8x256xf32>
    %54 = tpu.matmul %21, %53, %cst_19 {dimension_numbers = #tpu.dot_dimension_numbers<[1], [0], [0], [1], [0, 0, 1, 1], [], []>} : vector<8x36xf32>, vector<36x256xf32>, vector<8x256xf32> -> vector<8x256xf32>
    %55 = vector.broadcast %22 : vector<8x1xf32> to vector<8x256xf32>
    %56 = arith.addf %54, %55 : vector<8x256xf32>
    %cst_20 = arith.constant 0.000000e+00 : f32
    %57 = vector.broadcast %cst_20 : f32 to vector<8x256xf32>
    %58 = arith.maximumf %56, %57 : vector<8x256xf32>
    %c0_21 = arith.constant 0 : index
    %c0_22 = arith.constant 0 : index
    %c0_23 = arith.constant 0 : index
    %59 = vector.load %arg4[%c0_21, %c0_22, %c0_23] : memref<1x8x256xf32, #tpu.memory_space<vmem>>, vector<1x8x256xf32>
    %60 = vector.shape_cast %59 : vector<1x8x256xf32> to vector<8x256xf32>
    %61 = vector.shape_cast %58 : vector<8x256xf32> to vector<1x8x256xf32>
    tpu.vector_store %arg4[%c0_21, %c0_22, %c0_23], %61 {strides = array<i32>} : memref<1x8x256xf32, #tpu.memory_space<vmem>>, vector<1x8x256xf32>,
    return
  }
  func.func @transform_0(%arg0: i32) -> (i32, i32, i32) {
    %c0_i32 = arith.constant 0 : i32
    %c0_i32_0 = arith.constant 0 : i32
    %c0_i32_1 = arith.constant 0 : i32
    return %arg0, %c0_i32, %c0_i32_0 : i32, i32, i32
  }
  func.func @transform_1(%arg0: i32) -> (i32, i32) {
    %c0_i32 = arith.constant 0 : i32
    %c0_i32_0 = arith.constant 0 : i32
    %c0_i32_1 = arith.constant 0 : i32
    return %c0_i32, %c0_i32_0 : i32, i32
  }
  func.func @transform_2(%arg0: i32) -> (i32, i32) {
    %c0_i32 = arith.constant 0 : i32
    %c0_i32_0 = arith.constant 0 : i32
    %c0_i32_1 = arith.constant 0 : i32
    return %c0_i32, %c0_i32_0 : i32, i32
  }
  func.func @transform_3(%arg0: i32) -> (i32, i32, i32) {
    %c0_i32 = arith.constant 0 : i32
    %c0_i32_0 = arith.constant 0 : i32
    %c0_i32_1 = arith.constant 0 : i32
    return %arg0, %c0_i32, %c0_i32_0 : i32, i32, i32
  }
}

</mosaic_0001>

<bundles_post_ra>
// kernel: tpu_custom_call.1
= control target key start
LH: loop header
LB: loop body
LE: loop exit
PB: predicated region body
PF: predicated region fallthrough
CT: control target
= control target key end

     0   :  { %8 = vsyncpa [#allocation3], 0  ;;  %s882_s0 = inlined_call_operand.hbm [shape: f32[2,4,256], index: 0, kind: input, shape index: {}]   ;;  %s883_s1 = inlined_call_operand.vmem [shape: f32[8,36], index: 1, kind: input, shape index: {}]   ;;  %s884_s2 = inlined_call_operand.vmem [shape: f32[8,1], index: 2, kind: input, shape index: {}]   ;;  %s885_s3 = inlined_call_operand.hbm [shape: f32[2,8,256], index: 3, kind: output, shape index: {}]  }
   0x1   :  { %10 = vsyncpa [#allocation3 + $0x1], 0 }
   0x2   :  { %11 = vsyncpa [#allocation4], 0 }
   0x3   :  { %13 = vsyncpa [#allocation4 + $0x1], 0  ;;  %s732_s12 = smov 0   ;;  %s734_s13 = smov 0  }
   0x4   :  { %s736_s14 = smov 0   ;;  %s738_s15 = smov 0  }
   0x5 LB: > { %s753_s16 = sadd.s32 4294967295, %s701_s15   ;;  %s494_s17 = sadd.s32 4294967294, %s701_s15   ;;  %s701_s15 = sphi %s738_s15, %s895_s15   ;;  %s697_s14 = sphi %s736_s14, %s894_s14   ;;  %s693_s13 = sphi %s734_s13, %s893_s13   ;;  %s689_s12 = sphi %s732_s12, %s892_s12  }
   0x6   : > { %s757_s18 = sadd.s32 1, %s701_s15   ;;  %s26_s19 = sadd.s32 1, %s697_s14 }
   0x7   : > { %s23_s20 = ssub.s32 %s701_s15, %s757_s18  ;;  %p33_p0 = scmp.ne.s32.totalorder %s697_s14, %s693_s13 }
   0x8   : > { %p24_p1 = scmp.eq.s32.totalorder %s23_s20, 0  ;;  %p34_p2 = scmp.eq.s32.totalorder %s701_s15, 0 }
   0x9   : > { %p39_p3 = scmp.ne.s32.totalorder %s693_s13, %s689_s12  ;;  %p40_p4 = scmp.eq.s32.totalorder %s753_s16, 0 }
   0xa   : > { %s769_s21 = scalar_select %p24_p1, %s697_s14, %s26_s19  }
   0xb   : > { %p771_p5 = por %p34_p2, %p33_p0  ;;  %p775_p6 = por %p40_p4, %p39_p3 }
   0xc   : > { %p105_p7 = scmp.eq.s32.totalorder %s753_s16, 1  ;;  %p111_p8 = scmp.eq.s32.totalorder %s494_s17, 1 }
   0xd   : > { %p526_p10 = scmp.lt.s32.totalorder %s701_s15, 2  ;;  %s137_s26 = sand.u32 1, %s697_s14  }
   0xe   : > { %p782_p11 = por %p105_p7, %p33_p0  ;;  %p786_p12 = por %p111_p8, %p39_p3 }
   0xf   : > { %s512_s27 = sshll.u32 %s701_s15, 3  ;;  %s497_s28 = sshll.u32 %s137_s26, 3 }
  0x10   : > { %s146_s4 = scalar_lea.hbm %s882_s0, %s512_s27  ;;  %s141_s6 = scalar_lea.vmem [#allocation2], %s497_s28 }
  0x11   : > { %s148_s5 = sshll.u32 %s146_s4, 4  ;;  %s150_s7 = sshll.u32 %s141_s6, 4  ;;  %s149_s5 = int_to_ptr.hbm [resolvable:$true] %s148_s5  ;;  %s151_s7 = int_to_ptr.vmem [resolvable:$true] %s150_s7 }
  0x12   : > { %p797_p13 = pnand %p526_p10, %p771_p5  ;;  %p500_p0 = scmp.ge.s32.totalorder %s701_s15, 1 }
  0x13   : > { %p155_p1 = scmp.lt.s32.totalorder %s701_s15, 3  ;;  %s138_s9 = scalar_lea.sflag [#allocation3], %s137_s26 }
  0x14   : > { %s605_s10 = sshra.s32 %s149_s5, 4  ;;  %p609_p3 = pneg %p797_p13  ;;  %s606_s10 = int_to_ptr.hbm [resolvable:$true] %s605_s10 }
  0x15   : > { %s607_s11 = scalar_lea.hbm %s606_s10, 8  ;;  %s612_s20 = scalar_lea.hbm %s882_s0, 16 }
  0x16   : > { %p608_p2 = scmp.ne.s32.totalorder %s606_s10, %s607_s11  ;;  %p613_p5 = scmp.lt.s32.totalorder %s606_s10, %s882_s0 }
  0x17   : > { %p614_p8 = scmp.lt.s32.totalorder %s612_s20, %s607_s11 }
  0x18   : > { %p610_p4 = pnand %p609_p3, %p608_p2 }
  0x19   : > { %p615_p10 = por %p614_p8, %p613_p5 }
  0x1a   : > { %p611_p7 = pneg %p610_p4 }
  0x1c   : > { %p616_p9 = pnand %p615_p10, %p611_p7 }
  0x1e   : > { %619 = shalt.err (!%p616_p9)
}
  0x1f   : > { %521 = dma.hbm_to_vmem [thread:$0]  (!%p797_p13), %s149_s5, 128, %s151_s7, %s138_s9  }
  0x20   : > { %p156_p2 = pnand %p500_p0, %p155_p1 }
  0x21   : > { %s818_s26 = sand.u32 (!%p156_p2), 1, %s693_s13  }
  0x22   : > { %159 = sbr.rel (%p156_p2) target bundleno = 339 (0x153), region = 32  ;;  %s501_s28 = sshll.u32 (!%p156_p2), %s818_s26, 3 }
  0x23   : > { %s162_s29 = scalar_lea.sflag (!%p156_p2), [#allocation3], %s818_s26  ;;  %s165_s30 = scalar_lea.vmem (!%p156_p2), [#allocation2], %s501_s28 }
  0x27   : > { %680 = dma.done.wait (%p775_p6), %s162_s29, 128  }
  0x28   : > { %682 = vsyncadd (%p775_p6), %s162_s29, 4294967168  ;;  %v189_v0 = vlaneseq  ;;  %v222_v1 = vld [vmem:[%s165_s30] sm:$0xff]  ;;  %s703_s4 = smov 113   ;;  %s704_s23 = smov 111   ;;  %vm311_vm4 = vcmask 908288   ;;  %vm340_vm5 = vcmask 1043456  }
  0x29   : > { %224 = vst [vmem:[#allocation1] ss:$2 sm:$0xff] %v222_v1  ;;  %s705_s5 = smov 1   ;;  %s706_s6 = smov 127   ;;  %v221_v27 = vld [vmem:[%s884_s2] sm:$0xff]  ;;  %v711_v28 = vmov 0  }
  0x2a   : > { %v190_v2 = vand.u32 127, %v189_v0  ;;  %s707_s7 = smov 17   ;;  %s708_s8 = smov 15   ;;  %604 = vset.pattern.permute.xlu0 %v711_v28  ;;  %vm283_vm6 = vcmask 1039360   ;;  %vm275_vm7 = vcmask 7168   ;;  %vm291_vm8 = vcmask 924672  }
  0x2b   : > { %s709_s9 = smov 112   ;;  %s710_s10 = smov 16   ;;  %vm303_vm9 = vcmask 916480   ;;  %vm266_vm10 = vcmask 121856   ;;  %vm256_vm11 = vcmask 130048   ;;  %vm244_vm12 = vcmask 138240  }
  0x2c   : > { %v191_v3 = vadd.s32 128, %v190_v2  ;;  %v196_v7 = vand.u32 15, %v190_v2  ;;  %vm354_vm13 = vcmask 293888   ;;  %s502_s22 = sshll.u32 %s818_s26, 4  ;;  %s513_s27 = sshll.u32 %s753_s16, 4 }
  0x2d   : > { %s419_s30 = scalar_lea.hbm %s885_s3, %s513_s27  ;;  %s408_s16 = scalar_lea.sflag [#allocation4], %s818_s26 }
  0x2e   : > { %v203_v6 = vand.u32 15, %v191_v3  ;;  %vm216_vm0 = vcmp.ne.s32.totalorder %v196_v7, 15  ;;  %vm218_vm3 = vcmp.ne.s32.totalorder %v196_v7, 0 }
  0x30   : > { %v225_v4 = vld.sshfl [vmem:[#allocation1] sm:$0xff pattern:$0x75316420]  ;;  %v226_v5 = vld.sshfl [vmem:[#allocation1 + $0x8] sm:$0xff pattern:$0x75316420] }
  0x31   : > { %231 = vst [vmem:[#allocation1] ss:$2 sm:$0xff] %v222_v1  ;;  %vm217_vm1 = vcmp.ne.s32.totalorder %v203_v6, 15  ;;  %v229_v8 = vsel %vm216_vm0, %v225_v4, 0.0  ;;  %vm219_vm2 = vcmp.ne.s32.totalorder %v203_v6, 0 }
  0x32   : > { %v230_v9 = vsel %vm217_vm1, %v226_v5, 0.0 }
  0x33   : > { %v569_v10 = vpack.i.bf16 %v230_v9, %v229_v8 }
  0x35   : > { %570 = vrot.lane.b32.xlu2 %v569_v10, %s703_s4  ;;  %s188_s4 = scalar_lea.vmem [#allocation5], %s502_s22 }
  0x38   : > { %v233_v11 = vld.sshfl [vmem:[#allocation1 + $0x8] sm:$0xff pattern:$0x75316420]  ;;  %v232_v12 = vld.sshfl [vmem:[#allocation1] sm:$0xff pattern:$0x75316420] }
  0x39   : > { %v237_v13 = vsel %vm219_vm2, %v233_v11, 0.0  ;;  %v236_v14 = vsel %vm218_vm3, %v232_v12, 0.0  ;;  %249 = vst [vmem:[#allocation1] ss:$2 sm:$0xff] %v222_v1 }
  0x3a   : > { %309 = vrot.lane.b32.xlu1 %v237_v13, %s704_s23  ;;  %307 = vrot.lane.b32.xlu0 %v236_v14, %s704_s23  ;;  %v579_v15 = vpack.i.bf16 %v237_v13, %v236_v14  ;;  %s421_s23 = sshll.u32 %s188_s4, 4  ;;  %s422_s23 = int_to_ptr.vmem [resolvable:$true] %s421_s23 }
  0x3d   : > { %575 = vrot.lane.b32.xlu2 %v569_v10, %s705_s5  ;;  %s423_s5 = sshll.u32 %s419_s30, 4  ;;  %s424_s5 = int_to_ptr.hbm [resolvable:$true] %s423_s5 }
  0x40   : > { %v250_v16 = vld.sshfl [vmem:[#allocation1] sm:$0xff pattern:$0x75316420]  ;;  %v251_v17 = vld.sshfl [vmem:[#allocation1 + $0x8] sm:$0xff pattern:$0x75316420] }
  0x41   : > { %296 = vst [vmem:[#allocation1] ss:$2 sm:$0xff] %v222_v1  ;;  %v589_v21 = vpack.i.bf16 %v251_v17, %v250_v16 }
  0x42   : > { %580 = vrot.lane.b32.xlu1 %v579_v15, %s706_s6  ;;  %s649_s6 = sshra.s32 %s424_s5, 4  ;;  %s650_s6 = int_to_ptr.hbm [resolvable:$true] %s649_s6 }
  0x43   : > { %p656_p0 = scmp.lt.s32.totalorder %s650_s6, %s885_s3 }
  0x45   : > { %600 = vrot.lane.b32.xlu2 %v569_v10, %s707_s7  ;;  %s651_s7 = scalar_lea.hbm %s650_s6, 16 }
  0x46   : > { %p652_p6 = scmp.ne.s32.totalorder %s650_s6, %s651_s7 }
  0x48   : > { %v297_v18 = vld.sshfl [vmem:[#allocation1] sm:$0xff pattern:$0x75316420]  ;;  %v298_v19 = vld.sshfl [vmem:[#allocation1 + $0x8] sm:$0xff pattern:$0x75316420]  ;;  %p653_p9 = pnand %p652_p6, %p782_p11 }
  0x49   : > { %v584_v20 = vpack.i.bf16 %v298_v19, %v297_v18  ;;  %325 = vst [vmem:[#allocation1] ss:$2 sm:$0xff] %v222_v1 }
  0x4a   : > { %595 = vrot.lane.b32.xlu1 %v579_v15, %s708_s8  ;;  %v220_v15 = vld [vmem:[%s883_s1] sm:$0xff]  ;;  %p654_p13 = pneg %p653_p9 }
  0x4b   : > { %585 = vrot.lane.b32.xlu0 %v584_v20, %s709_s9 }
  0x50   : > { %v326_v56 = vld.sshfl [vmem:[#allocation1] sm:$0xff pattern:$0x75316420]  ;;  %v327_v57 = vld.sshfl [vmem:[#allocation1 + $0x8] sm:$0xff pattern:$0x75316420] }
  0x53   : > { %590 = vrot.lane.b32.xlu0 %v589_v21, %s710_s10  ;;  %s655_s10 = scalar_lea.hbm %s885_s3, 32 }
  0x54   : > { %p657_p1 = scmp.lt.s32.totalorder %s655_s10, %s651_s7 }
  0x56   : > { %p658_p3 = por %p657_p1, %p656_p0 }
  0x58   : > { %p659_p4 = pnand %p658_p3, %p654_p13 }
  0x5b   : > { %351 = vperm.xlu0 %604, %v221_v27  }
  0x8f   : > { %v571_v26 = vpop.permute.xlu2 %570 }
  0x90   : > { %v573_v33 = vunpack.i.h.bf16 %v571_v26  ;;  %v572_v36 = vunpack.i.l.bf16 %v571_v26 }
  0x92   : > { %v295_v44 = vsel %vm291_vm8, %v573_v33, 0.0  ;;  %v292_v55 = vsel %vm291_vm8, %v572_v36, %v573_v33 }
  0x97   : > { %v576_v30 = vpop.permute.xlu2 %575 }
  0x98   : > { %v578_v34 = vunpack.i.h.bf16 %v576_v30  ;;  %v577_v35 = vunpack.i.l.bf16 %v576_v30 }
  0x9a   : > { %v278_v43 = vsel %vm275_vm7, 0.0, %v577_v35  ;;  %v276_v45 = vsel %vm275_vm7, %v577_v35, %v578_v34 }
  0x9b   : > { %v321_v58 = vrot.slane %v278_v43, 4  ;;  %v322_v61 = vrot.slane %v276_v45, 4 }
  0x9f   : > { %v601_v54 = vpop.permute.xlu2 %600 }
  0xa0   : > { %v603_v63 = vunpack.i.h.bf16 %v601_v54  ;;  %v602_v0 = vunpack.i.l.bf16 %v601_v54 }
  0xa2   : > { %v248_v10 = vsel %vm244_vm12, 0.0, %v602_v0  ;;  %v245_v11 = vsel %vm244_vm12, %v602_v0, %v603_v63 }
  0xac   : > { %v310_v22 = vpop.permute.xlu1 %309  ;;  %v308_v23 = vpop.permute.xlu0 %307 }
  0xad   : > { %v312_v24 = vsel %vm311_vm4, %v308_v23, %v310_v22  ;;  %v314_v25 = vsel %vm311_vm4, %v310_v22, 0.0 }
  0xae   : > { %503 = vmatpush.msk.msra.mxu0 %vm340_vm5, %v312_v24  ;;  %505 = vmatpush.msk.msra.mxu1 %vm340_vm5, %v314_v25 }
  0xb4   : > { %v581_v29 = vpop.permute.xlu1 %580 }
  0xb5   : > { %v583_v31 = vunpack.i.h.bf16 %v581_v29  ;;  %v582_v32 = vunpack.i.l.bf16 %v581_v29 }
  0xb7   : > { %v286_v39 = vsel %vm283_vm6, %v583_v31, 0.0  ;;  %v284_v42 = vsel %vm283_vm6, %v582_v32, %v583_v31 }
  0xb8   : > { %v332_v50 = vrot.slane %v286_v39, 4  ;;  %v331_v53 = vrot.slane %v284_v42, 4 }
  0xba   : > { %v345_v3 = vsel %vm340_vm5, %v326_v56, %v331_v53  ;;  %v346_v4 = vsel %vm340_vm5, %v327_v57, %v332_v50 }
  0xbc   : > { %v596_v38 = vpop.permute.xlu1 %595 }
  0xbd   : > { %v586_v37 = vpop.permute.xlu0 %585  ;;  %v598_v47 = vunpack.i.h.bf16 %v596_v38  ;;  %v597_v48 = vunpack.i.l.bf16 %v596_v38 }
  0xbe   : > { %v588_v40 = vunpack.i.h.bf16 %v586_v37  ;;  %v587_v41 = vunpack.i.l.bf16 %v586_v37 }
  0xbf   : > { %v270_v62 = vsel %vm266_vm10, 0.0, %v597_v48  ;;  %v267_v1 = vsel %vm266_vm10, %v597_v48, %v598_v47 }
  0xc0   : > { %v306_v46 = vsel %vm303_vm9, %v588_v40, 0.0  ;;  %v304_v49 = vsel %vm303_vm9, %v587_v41, %v588_v40  ;;  %v343_v7 = vsel %vm340_vm5, %v270_v62, %v321_v58  ;;  %v344_v8 = vsel %vm340_vm5, %v267_v1, %v322_v61 }
  0xc1   : > { %v337_v51 = vrot.slane %v306_v46, 4  ;;  %v336_v52 = vrot.slane %v304_v49, 4 }
  0xc3   : > { %v347_v59 = vsel %vm340_vm5, %v292_v55, %v336_v52  ;;  %v348_v60 = vsel %vm340_vm5, %v295_v44, %v337_v51 }
  0xc4   : > { %375 = vmatpush.msra.mxu0 %v347_v59  ;;  %395 = vmatpush.msra.mxu1 %v348_v60 }
  0xc5   : > { %v591_v2 = vpop.permute.xlu0 %590 }
  0xc6   : > { %v593_v5 = vunpack.i.h.bf16 %v591_v2  ;;  %v592_v6 = vunpack.i.l.bf16 %v591_v2  ;;  %376 = vmatpush.msra.mxu0 %v345_v3  ;;  %396 = vmatpush.msra.mxu1 %v346_v4 }
  0xc8   : > { %v259_v9 = vsel %vm256_vm11, 0.0, %v592_v6  ;;  %377 = vmatpush.msra.mxu0 %v343_v7  ;;  %397 = vmatpush.msra.mxu1 %v344_v8  ;;  %v257_v12 = vsel %vm256_vm11, %v592_v6, %v593_v5 }
  0xc9   : > { %v316_v13 = vrot.slane %v259_v9, 4  ;;  %v317_v14 = vrot.slane %v257_v12, 4 }
  0xcb   : > { %v341_v16 = vsel %vm340_vm5, %v248_v10, %v316_v13  ;;  %v342_v17 = vsel %vm340_vm5, %v245_v11, %v317_v14 }
  0xcc   : > { %378 = vmatpush.msra.mxu0 %v341_v16  ;;  %398 = vmatpush.msra.mxu1 %v342_v17 }
  0xcd   : > { %504 = vmatmul.msk.f32.vlgmr.msra.gmra.mxu0 %vm354_vm13, %v220_v15  ;;  %506 = vmatmul.msk.f32.vlgmr.msra.gmra.mxu1 %vm354_vm13, %v220_v15  ;;  %v352_v18 = vpop.permute.xlu0 %351 }
 0x14a   : > { %v380_v19 = vpop.f32.mrf.mxu0  ;;  %v400_v20 = vpop.f32.mrf.mxu1 }
 0x14b   : > { %v381_v21 = vadd.f32 %v380_v19, %v352_v18  ;;  %v401_v22 = vadd.f32 %v400_v20, %v352_v18 }
 0x14d   : > { %v403_v23 = vmax.f32 %v381_v21, 0.0  ;;  %v404_v24 = vmax.f32 %v401_v22, 0.0 }
 0x14f   : > { %405 = vst [vmem:[%s188_s4] sm:$0xff] %v403_v23 }
 0x150   : > { %406 = vst [vmem:[%s188_s4 + $0x8] sm:$0xff] %v404_v24 }
 0x151   : > { %662 = shalt.err (!%p659_p4)
}
 0x152   : > { %516 = dma.vmem_to_hbm [thread:$0]  (%p782_p11), %s422_s23, 256, %s424_s5, %s408_s16  }
 0x153 PF: > { %s435_s26 = sand.u32 1, %s689_s12   ;;  %p891_p7 = scmp.ge.s32.totalorder %s701_s15, 2 }
 0x154   : > { %s436_s19 = scalar_lea.sflag [#allocation4], %s435_s26 }
 0x155   : > { %p523_p5 = pnand %p891_p7, %p786_p12 }
 0x157   : > { %p524_p8 = pneg %p523_p5 }
 0x159   : > { %684 = dma.done.wait (%p524_p8), %s436_s19, 256  }
 0x15a   : > { %686 = vsyncadd (%p524_p8), %s436_s19, 4294967040  ;;  %p16_p10 = scmp.ge.s32.totalorder %s757_s18, 4   ;;  %s892_s12 = smov %s693_s13 }
 0x15b   : > { %s893_s13 = smov %s697_s14  ;;  %s894_s14 = smov %s769_s21 }
 0x15c   : > { %s895_s15 = smov %s757_s18  ;;  %18 = sbr.rel (!%p16_p10) target bundleno = 5 (0x5), region = 77 }
 0x161   :  { %442 = vsyncpa [#allocation3], 1 }
 0x162   :  { %444 = vsyncpa [#allocation3 + $0x1], 1 }
 0x163   :  { %445 = vsyncpa [#allocation4], 1 }
 0x164   :  { %447 = vsyncpa [#allocation4 + $0x1], 1 }

</bundles_post_ra>
